<compile_context>
chip_gen: v6e
topology: v6e:2x2x1
jax: 0.10.0
libtpu: 0.0.40
codegen_flags: <defaults>
</compile_context>

<pallas_src>
import math
import functools

import jax
import jax.numpy as jnp
from jax import lax
from jax.experimental import pallas as pl
from jax.experimental.pallas import tpu as pltpu


# -----------------------------------------------------------------------------
# Kernel A: fused squared distances + k-NN density (+ tie-break noise) + score.
# -----------------------------------------------------------------------------
def _dpc_score_kernel(x_ref, sq_row_ref, noise_ref, score_ref, *, k, inv_c):
    x = x_ref[0]                                  # (N, C) original dtype -> MXU operand
    sq_row = sq_row_ref[0]                        # (1, N) f32  ||x_b||^2 (lane-dense)
    noise = noise_ref[0]                          # (1, N) f32  tie-break noise (pre-scaled)
    n = x.shape[0]

    # ||x_a||^2 as a sublane column, computed in-kernel (cheap, under MXU slack).
    xf = x.astype(jnp.float32)
    sq_col = jnp.sum(xf * xf, axis=1, keepdims=True)                  # (N, 1)

    # Squared, 1/C-scaled pairwise distances (== (cdist / sqrt(C))^2).
    # Gram on the MXU in the input dtype; squared norms broadcast on the VPU.
    gram = lax.dot_general(x, x, (((1,), (1,)), ((), ())),
                           preferred_element_type=jnp.float32)        # (N, N)
    d2 = jnp.maximum(sq_col + sq_row - 2.0 * gram, 0.0) * inv_c       # symmetric

    iota_r = lax.broadcasted_iota(jnp.int32, (n, n), 0)
    iota_c = lax.broadcasted_iota(jnp.int32, (n, n), 1)
    eye = iota_r == iota_c

    # --- k-NN local density: sum of the k smallest squared distances. ---
    # The smallest entry of every column is the zero self-distance, so mask the
    # diagonal once and run only (k - 1) min/extract passes.  First-occurrence
    # masking keeps torch.topk tie semantics; the `first` hit already implies
    # equality with the min, so no extra `eq &` pass is needed.
    work0 = jnp.where(eye, jnp.inf, d2)
    acc0 = jnp.zeros((1, n), jnp.float32)

    def knn_body(_, carry):
        acc, work = carry
        m = jnp.min(work, axis=0, keepdims=True)                      # (1, N)
        first = jnp.min(jnp.where(work == m, iota_r, n),
                        axis=0, keepdims=True)                        # (1, N)
        work = jnp.where(iota_r == first, jnp.inf, work)
        return acc + m, work

    acc, _ = lax.fori_loop(0, k - 1, knn_body, (acc0, work0), unroll=True)
    den_row = jnp.exp(-(acc * (1.0 / float(k)))) + noise              # (1, N)

    # Lane -> sublane relayout of the density via an identity matmul on the
    # MXU (slack unit) — replaces the old O(N^2) VPU select + XLU lane reduce;
    # `eye` is reused from the diagonal mask above.
    den_col = lax.dot_general(eye.astype(jnp.float32), den_row,
                              (((1,), (1,)), ((), ())),
                              preferred_element_type=jnp.float32)     # (N, 1)

    # --- distance to nearest higher-density token, then score. ---
    d2max = jnp.max(jnp.max(d2, axis=1, keepdims=True), axis=0, keepdims=True)
    higher = den_col > den_row            # higher[a, b] = density[a] > density[b]
    masked = jnp.where(higher, d2, d2max)
    dmin2 = jnp.min(masked, axis=0, keepdims=True)                    # (1, N)
    score_ref[0] = jnp.sqrt(dmin2) * den_row                          # lane-dense


def dpc_score(x, sq_row, noise, k):
    B, N, C = x.shape
    kern = functools.partial(_dpc_score_kernel, k=k, inv_c=1.0 / float(C))
    # Rough live-set estimate: a handful of (N, N) f32 temps (d2, work, iotas,
    # masked) plus double-buffered inputs.  Clamped to v7x's 64 MiB physical.
    # TODO(synk): once this estimate exceeds ~64 MiB, switch to the row-tiled
    # two-pass structure instead of raising the limit further.
    est = 8 * N * N * 4 + 4 * N * (C + 4) * 4
    vmem_limit = int(min(64 * 1024 * 1024, max(32 * 1024 * 1024, est)))
    return pl.pallas_call(
        kern,
        out_shape=jax.ShapeDtypeStruct((B, 1, N), jnp.float32),
        grid=(B,),
        in_specs=[pl.BlockSpec((1, N, C), lambda b: (b, 0, 0)),
                  pl.BlockSpec((1, 1, N), lambda b: (b, 0, 0)),
                  pl.BlockSpec((1, 1, N), lambda b: (b, 0, 0))],
        out_specs=pl.BlockSpec((1, 1, N), lambda b: (b, 0, 0)),
        compiler_params=pltpu.CompilerParams(
            dimension_semantics=("parallel",),
            vmem_limit_bytes=vmem_limit),
    )(x, sq_row, noise)


# -----------------------------------------------------------------------------
# Fused kernel B+C: cluster assignment (with center override) + token merging.
# -----------------------------------------------------------------------------
def _assign_merge_kernel(xc_ref, idn_ref, x_ref, w_ref, idx_ref, xm_ref, nw_ref):
    xc = xc_ref[0]                                # (S, C) gathered centers, original dtype
    idn = idn_ref[0]                              # (S, 1) int32 center token indices
    x = x_ref[0]                                  # (N, C) original dtype
    w_row = w_ref[0]                              # (1, N) f32 token weights
    s = xc.shape[0]
    n = x.shape[0]

    # --- assignment: argmin over centers of the squared distance. ---
    # The + ||x_n||^2 term is constant per token column, so it is dropped
    # (does not change the argmin); only the center norms are needed.
    gram = lax.dot_general(xc, x, (((1,), (1,)), ((), ())),
                           preferred_element_type=jnp.float32)        # (S, N) MXU
    xcf = xc.astype(jnp.float32)
    sqc = jnp.sum(xcf * xcf, axis=1, keepdims=True)                   # (S, 1)
    dsur = sqc - 2.0 * gram                                           # (S, N)

    # Fold the reference's center-index override (idx_cluster[index_down[j]]=j)
    # into the argmin: center s always wins at its own token column.
    iota_s = lax.broadcasted_iota(jnp.int32, (s, n), 0)
    iota_n = lax.broadcasted_iota(jnp.int32, (s, n), 1)
    dsur = jnp.where(iota_n == idn, -jnp.inf, dsur)

    mn = jnp.min(dsur, axis=0, keepdims=True)                         # (1, N)
    idx = jnp.min(jnp.where(dsur == mn, iota_s, s),
                  axis=0, keepdims=True)                              # first-occurrence argmin
    idx_ref[0] = idx

    # --- merge: index_add as a one-hot MXU matmul with weights folded in. ---
    onehot = (iota_s == idx).astype(jnp.float32)                      # (S, N)
    counts = jnp.sum(onehot * w_row, axis=1, keepdims=True)           # (S, 1) cluster weight
    inv_all = 1.0 / (counts + 1e-6)                                   # (S, 1)
    merge_w = onehot * w_row * inv_all                                # (S, N) = onehot * norm_weight
    # Per-token normalised weight = column sum of merge_w (exactly one active
    # cluster per token) -> lane-dense row, no per-token all_weight gather.
    nw_ref[0] = jnp.sum(merge_w, axis=0, keepdims=True)               # (1, N)
    # TODO(synk): feed bf16 MXU operands here on v6e/v7x once validated against
    # the f32 reference (cancellation risk flagged in the review).
    xm = lax.dot_general(merge_w, x.astype(jnp.float32),
                         (((1,), (0,)), ((), ())),
                         preferred_element_type=jnp.float32)          # (S, C)
    # TODO(synk): with C < 128 this store is a masked vst; pad dim_out to a
    # multiple of 128 (or present a lane-dense slab) for store-bound shapes.
    xm_ref[0] = xm.astype(xm_ref.dtype)


def assign_and_merge(xc, index_down_col, x, w_row, cluster_num):
    B, N, C = x.shape
    S = cluster_num
    return pl.pallas_call(
        _assign_merge_kernel,
        out_shape=(jax.ShapeDtypeStruct((B, 1, N), jnp.int32),
                   jax.ShapeDtypeStruct((B, S, C), x.dtype),
                   jax.ShapeDtypeStruct((B, 1, N), jnp.float32)),
        grid=(B,),
        in_specs=[pl.BlockSpec((1, S, C), lambda b: (b, 0, 0)),
                  pl.BlockSpec((1, S, 1), lambda b: (b, 0, 0)),
                  pl.BlockSpec((1, N, C), lambda b: (b, 0, 0)),
                  pl.BlockSpec((1, 1, N), lambda b: (b, 0, 0))],
        out_specs=(pl.BlockSpec((1, 1, N), lambda b: (b, 0, 0)),
                   pl.BlockSpec((1, S, C), lambda b: (b, 0, 0)),
                   pl.BlockSpec((1, 1, N), lambda b: (b, 0, 0))),
        compiler_params=pltpu.CompilerParams(dimension_semantics=("parallel",)),
    )(xc, index_down_col, x, w_row)


# -----------------------------------------------------------------------------
# CTM forward (mask=None path, matching the module as exercised here)
# -----------------------------------------------------------------------------
class CTM:
    def __init__(self, sample_ratio, embed_dim, dim_out, k=5):
        self.sample_ratio = sample_ratio
        self.dim_out = dim_out
        self.k = k

    def forward(self, token_dict, noise_key, sample_ratio=None):
        # TODO(synk): token_dict['mask'] != None branch (padded-token masking) not implemented.
        x = token_dict["x"]
        B, N, C = x.shape
        token_weight = jnp.ones((B, 1, N), jnp.float32)       # lane-dense weights

        if sample_ratio is not None:
            cluster_num = max(math.ceil(N * sample_ratio), 1)
        elif self.sample_ratio > 1:
            cluster_num = max(math.ceil(self.sample_ratio), 1)
        else:
            cluster_num = max(math.ceil(N * self.sample_ratio), 1)
        k = min(3, max(cluster_num // 2, 1)) if self.k > cluster_num else self.k

        # ---- cluster_dpc_knn (kernel A + tiny top_k glue) ----
        sq_row = jnp.sum(x.astype(jnp.float32) ** 2, axis=-1)[:, None, :]   # (B, 1, N)
        # Tie-break noise scaled by 1e-6 (review fix): the pasted torch module
        # adds unscaled rand, but the noise is meant purely to break density
        # ties, not to reorder densities.
        noise = 1e-6 * jax.random.uniform(noise_key, (B, 1, N), jnp.float32)

        score = dpc_score(x, sq_row, noise, k)[:, 0, :]                 # (B, N)
        _, index_down = lax.top_k(score, cluster_num)                   # (B, S)
        index_down = index_down.astype(jnp.int32)

        # Gather the S centers (tiny) once; assignment, the center-index
        # override and the weighted merge are fused in one kernel so x is read
        # from HBM only once in this phase and the XLA scatter is eliminated.
        xc = jnp.take_along_axis(x, index_down[:, :, None], axis=1)     # (B, S, C)
        idx_row, x_merged, norm_w_row = assign_and_merge(
            xc, index_down[:, :, None], x, token_weight, cluster_num)

        idx_cluster = idx_row[:, 0, :]                                  # (B, N)
        norm_weight = jnp.reshape(norm_w_row, (B, N, 1))                # (B, N, 1)

        idx_token = token_dict["idx_token"]
        agg_weight = token_dict["agg_weight"]
        idx_token_new = jnp.take_along_axis(idx_cluster, idx_token, axis=1)
        weight_t = jnp.take_along_axis(norm_weight, idx_token[..., None], axis=1)
        agg_weight_new = agg_weight * weight_t

        down_dict = {
            "x": x_merged,
            "token_num": cluster_num,
            "idx_token": idx_token_new,
            "agg_weight": agg_weight_new,
            "mask": None,
        }
        return down_dict, token_dict


if __name__ == "__main__":
    B, N, C = 2, 16, 32
    key = jax.random.PRNGKey(0)
    kx, knoise = jax.random.split(key)

    x = jax.random.normal(kx, (B, N, C), dtype=jnp.float32)
    token_dict = {
        "x": x,
        "token_num": N,
        "idx_token": jnp.broadcast_to(jnp.arange(N, dtype=jnp.int32)[None, :], (B, N)),
        "agg_weight": jnp.ones((B, N, 1), jnp.float32),
        "mask": None,
    }

    ctm = CTM(sample_ratio=0.5, embed_dim=C, dim_out=C, k=5)
    down_dict, token_dict_out = ctm.forward(token_dict, knoise)

    jax.block_until_ready(down_dict["x"])
    jax.block_until_ready(down_dict["idx_token"])
    jax.block_until_ready(down_dict["agg_weight"])

    assert down_dict["x"].shape == (B, 8, C)
    assert down_dict["idx_token"].shape == (B, N)
    assert down_dict["agg_weight"].shape == (B, N, 1)
    print("KERNEL_OK")
</pallas_src>

<mosaic_0001>
module attributes {stable_mosaic.version = 11 : i64} {
  func.func @_dpc_score_kernel(%arg0: i32, %arg1: memref<1x16x32xf32, #tpu.memory_space<vmem>>, %arg2: memref<1x1x16xf32, #tpu.memory_space<vmem>>, %arg3: memref<1x1x16xf32, #tpu.memory_space<vmem>>, %arg4: memref<1x1x16xf32, #tpu.memory_space<vmem>>) attributes {dimension_semantics = [#tpu.dimension_semantics<parallel>], iteration_bounds = array<i64: 2>, scalar_prefetch = 0 : i64, scratch_operands = 0 : i64, tpu.core_type = #tpu.core_type<tc>, window_params = [{transform_indices = @transform_0, window_bounds = array<i64: 1, 16, 32>}, {transform_indices = @transform_1, window_bounds = array<i64: 1, 1, 16>}, {transform_indices = @transform_2, window_bounds = array<i64: 1, 1, 16>}, {transform_indices = @transform_3, window_bounds = array<i64: 1, 1, 16>}]} {
    %c0 = arith.constant 0 : index
    %c0_0 = arith.constant 0 : index
    %c0_1 = arith.constant 0 : index
    %0 = vector.load %arg1[%c0, %c0_0, %c0_1] : memref<1x16x32xf32, #tpu.memory_space<vmem>>, vector<1x16x32xf32>
    %1 = vector.shape_cast %0 : vector<1x16x32xf32> to vector<16x32xf32>
    %c0_2 = arith.constant 0 : index
    %c0_3 = arith.constant 0 : index
    %c0_4 = arith.constant 0 : index
    %2 = vector.load %arg2[%c0_2, %c0_3, %c0_4] : memref<1x1x16xf32, #tpu.memory_space<vmem>>, vector<1x1x16xf32>
    %3 = vector.shape_cast %2 : vector<1x1x16xf32> to vector<1x16xf32>
    %c0_5 = arith.constant 0 : index
    %c0_6 = arith.constant 0 : index
    %c0_7 = arith.constant 0 : index
    %4 = vector.load %arg3[%c0_5, %c0_6, %c0_7] : memref<1x1x16xf32, #tpu.memory_space<vmem>>, vector<1x1x16xf32>
    %5 = vector.shape_cast %4 : vector<1x1x16xf32> to vector<1x16xf32>
    %6 = arith.mulf %1, %1 : vector<16x32xf32>
    %cst = arith.constant dense<0.000000e+00> : vector<16xf32>
    %7 = vector.multi_reduction <add>, %6, %cst [1] : vector<16x32xf32> to vector<16xf32>
    %8 = vector.shape_cast %7 : vector<16xf32> to vector<16x1xf32>
    %cst_8 = arith.constant dense<0.000000e+00> : vector<16x16xf32>
    %9 = tpu.matmul %1, %1, %cst_8 {dimension_numbers = #tpu.dot_dimension_numbers<[1], [1], [0], [0], [0, 0, 1, 0], [], []>} : vector<16x32xf32>, vector<16x32xf32>, vector<16x16xf32> -> vector<16x16xf32>
    %10 = vector.broadcast %8 : vector<16x1xf32> to vector<16x16xf32>
    %11 = vector.broadcast %3 : vector<1x16xf32> to vector<16x16xf32>
    %12 = arith.addf %10, %11 : vector<16x16xf32>
    %cst_9 = arith.constant 2.000000e+00 : f32
    %13 = vector.broadcast %cst_9 : f32 to vector<16x16xf32>
    %14 = arith.mulf %13, %9 : vector<16x16xf32>
    %15 = arith.subf %12, %14 : vector<16x16xf32>
    %cst_10 = arith.constant 0.000000e+00 : f32
    %16 = vector.broadcast %cst_10 : f32 to vector<16x16xf32>
    %17 = arith.maximumf %15, %16 : vector<16x16xf32>
    %cst_11 = arith.constant 3.125000e-02 : f32
    %18 = vector.broadcast %cst_11 : f32 to vector<16x16xf32>
    %19 = arith.mulf %17, %18 : vector<16x16xf32>
    %20 = tpu.iota {dimensions = array<i32: 0>} : vector<16x16xi32>
    %21 = tpu.iota {dimensions = array<i32: 1>} : vector<16x16xi32>
    %22 = arith.cmpi eq, %20, %21 : vector<16x16xi32>
    %cst_12 = arith.constant 0x7F800000 : f32
    %23 = vector.broadcast %cst_12 : f32 to vector<16x16xf32>
    %24 = arith.select %22, %23, %19 : vector<16x16xi1>, vector<16x16xf32>
    %cst_13 = arith.constant 0.000000e+00 : f32
    %25 = vector.broadcast %cst_13 : f32 to vector<1x16xf32>
    %c0_i32 = arith.constant 0 : i32
    %cst_14 = arith.constant dense<0x7F800000> : vector<16xf32>
    %26 = vector.multi_reduction <minimumf>, %24, %cst_14 [0] : vector<16x16xf32> to vector<16xf32>
    %27 = vector.shape_cast %26 : vector<16xf32> to vector<1x16xf32>
    %28 = vector.broadcast %27 : vector<1x16xf32> to vector<16x16xf32>
    %29 = arith.cmpf oeq, %24, %28 : vector<16x16xf32>
    %c16_i32 = arith.constant 16 : i32
    %30 = vector.broadcast %c16_i32 : i32 to vector<16x16xi32>
    %31 = arith.select %29, %20, %30 : vector<16x16xi1>, vector<16x16xi32>
    %cst_15 = arith.constant dense<2147483647> : vector<16xi32>
    %32 = vector.multi_reduction <minsi>, %31, %cst_15 [0] : vector<16x16xi32> to vector<16xi32>
    %33 = vector.shape_cast %32 : vector<16xi32> to vector<1x16xi32>
    %34 = vector.broadcast %33 : vector<1x16xi32> to vector<16x16xi32>
    %35 = arith.cmpi eq, %20, %34 : vector<16x16xi32>
    %cst_16 = arith.constant 0x7F800000 : f32
    %36 = vector.broadcast %cst_16 : f32 to vector<16x16xf32>
    %37 = arith.select %35, %36, %24 : vector<16x16xi1>, vector<16x16xf32>
    %38 = arith.addf %25, %27 : vector<1x16xf32>
    %c1_i32 = arith.constant 1 : i32
    %cst_17 = arith.constant dense<0x7F800000> : vector<16xf32>
    %39 = vector.multi_reduction <minimumf>, %37, %cst_17 [0] : vector<16x16xf32> to vector<16xf32>
    %40 = vector.shape_cast %39 : vector<16xf32> to vector<1x16xf32>
    %41 = vector.broadcast %40 : vector<1x16xf32> to vector<16x16xf32>
    %42 = arith.cmpf oeq, %37, %41 : vector<16x16xf32>
    %c16_i32_18 = arith.constant 16 : i32
    %43 = vector.broadcast %c16_i32_18 : i32 to vector<16x16xi32>
    %44 = arith.select %42, %20, %43 : vector<16x16xi1>, vector<16x16xi32>
    %cst_19 = arith.constant dense<2147483647> : vector<16xi32>
    %45 = vector.multi_reduction <minsi>, %44, %cst_19 [0] : vector<16x16xi32> to vector<16xi32>
    %46 = vector.shape_cast %45 : vector<16xi32> to vector<1x16xi32>
    %47 = vector.broadcast %46 : vector<1x16xi32> to vector<16x16xi32>
    %48 = arith.cmpi eq, %20, %47 : vector<16x16xi32>
    %cst_20 = arith.constant 0x7F800000 : f32
    %49 = vector.broadcast %cst_20 : f32 to vector<16x16xf32>
    %50 = arith.select %48, %49, %37 : vector<16x16xi1>, vector<16x16xf32>
    %51 = arith.addf %38, %40 : vector<1x16xf32>
    %c2_i32 = arith.constant 2 : i32
    %cst_21 = arith.constant dense<0x7F800000> : vector<16xf32>
    %52 = vector.multi_reduction <minimumf>, %50, %cst_21 [0] : vector<16x16xf32> to vector<16xf32>
    %53 = vector.shape_cast %52 : vector<16xf32> to vector<1x16xf32>
    %54 = vector.broadcast %53 : vector<1x16xf32> to vector<16x16xf32>
    %55 = arith.cmpf oeq, %50, %54 : vector<16x16xf32>
    %c16_i32_22 = arith.constant 16 : i32
    %56 = vector.broadcast %c16_i32_22 : i32 to vector<16x16xi32>
    %57 = arith.select %55, %20, %56 : vector<16x16xi1>, vector<16x16xi32>
    %cst_23 = arith.constant dense<2147483647> : vector<16xi32>
    %58 = vector.multi_reduction <minsi>, %57, %cst_23 [0] : vector<16x16xi32> to vector<16xi32>
    %59 = vector.shape_cast %58 : vector<16xi32> to vector<1x16xi32>
    %60 = vector.broadcast %59 : vector<1x16xi32> to vector<16x16xi32>
    %61 = arith.cmpi eq, %20, %60 : vector<16x16xi32>
    %cst_24 = arith.constant 0x7F800000 : f32
    %62 = vector.broadcast %cst_24 : f32 to vector<16x16xf32>
    %63 = arith.select %61, %62, %50 : vector<16x16xi1>, vector<16x16xf32>
    %64 = arith.addf %51, %53 : vector<1x16xf32>
    %c3_i32 = arith.constant 3 : i32
    %cst_25 = arith.constant dense<0x7F800000> : vector<16xf32>
    %65 = vector.multi_reduction <minimumf>, %63, %cst_25 [0] : vector<16x16xf32> to vector<16xf32>
    %66 = vector.shape_cast %65 : vector<16xf32> to vector<1x16xf32>
    %67 = vector.broadcast %66 : vector<1x16xf32> to vector<16x16xf32>
    %68 = arith.cmpf oeq, %63, %67 : vector<16x16xf32>
    %c16_i32_26 = arith.constant 16 : i32
    %69 = vector.broadcast %c16_i32_26 : i32 to vector<16x16xi32>
    %70 = arith.select %68, %20, %69 : vector<16x16xi1>, vector<16x16xi32>
    %cst_27 = arith.constant dense<2147483647> : vector<16xi32>
    %71 = vector.multi_reduction <minsi>, %70, %cst_27 [0] : vector<16x16xi32> to vector<16xi32>
    %72 = vector.shape_cast %71 : vector<16xi32> to vector<1x16xi32>
    %73 = vector.broadcast %72 : vector<1x16xi32> to vector<16x16xi32>
    %74 = arith.cmpi eq, %20, %73 : vector<16x16xi32>
    %cst_28 = arith.constant 0x7F800000 : f32
    %75 = vector.broadcast %cst_28 : f32 to vector<16x16xf32>
    %76 = arith.select %74, %75, %63 : vector<16x16xi1>, vector<16x16xf32>
    %77 = arith.addf %64, %66 : vector<1x16xf32>
    %cst_29 = arith.constant 2.000000e-01 : f32
    %78 = vector.broadcast %cst_29 : f32 to vector<1x16xf32>
    %79 = arith.mulf %77, %78 : vector<1x16xf32>
    %cst_30 = arith.constant 0.000000e+00 : f32
    %80 = vector.broadcast %cst_30 : f32 to vector<1x16xf32>
    %81 = arith.subf %80, %79 : vector<1x16xf32>
    %82 = math.exp %81 : vector<1x16xf32>
    %83 = arith.addf %82, %5 : vector<1x16xf32>
    %84 = arith.extui %22 : vector<16x16xi1> to vector<16x16xi32>
    %85 = arith.sitofp %84 : vector<16x16xi32> to vector<16x16xf32>
    %cst_31 = arith.constant dense<0.000000e+00> : vector<16x1xf32>
    %86 = tpu.matmul %85, %83, %cst_31 {dimension_numbers = #tpu.dot_dimension_numbers<[1], [1], [0], [0], [0, 0, 1, 0], [], []>} : vector<16x16xf32>, vector<1x16xf32>, vector<16x1xf32> -> vector<16x1xf32>
    %cst_32 = arith.constant dense<0xFF800000> : vector<16xf32>
    %87 = vector.multi_reduction <maximumf>, %19, %cst_32 [1] : vector<16x16xf32> to vector<16xf32>
    %88 = vector.shape_cast %87 : vector<16xf32> to vector<16x1xf32>
    %cst_33 = arith.constant dense<0xFF800000> : vector<1xf32>
    %89 = vector.multi_reduction <maximumf>, %88, %cst_33 [0] : vector<16x1xf32> to vector<1xf32>
    %90 = vector.shape_cast %89 : vector<1xf32> to vector<1x1xf32>
    %91 = vector.broadcast %86 : vector<16x1xf32> to vector<16x16xf32>
    %92 = vector.broadcast %83 : vector<1x16xf32> to vector<16x16xf32>
    %93 = arith.cmpf ogt, %91, %92 : vector<16x16xf32>
    %94 = vector.shape_cast %90 : vector<1x1xf32> to vector<1x1xf32>
    %95 = vector.broadcast %94 : vector<1x1xf32> to vector<16x16xf32>
    %96 = arith.select %93, %19, %95 : vector<16x16xi1>, vector<16x16xf32>
    %cst_34 = arith.constant dense<0x7F800000> : vector<16xf32>
    %97 = vector.multi_reduction <minimumf>, %96, %cst_34 [0] : vector<16x16xf32> to vector<16xf32>
    %98 = vector.shape_cast %97 : vector<16xf32> to vector<1x16xf32>
    %99 = math.sqrt %98 : vector<1x16xf32>
    %100 = arith.mulf %99, %83 : vector<1x16xf32>
    %c0_35 = arith.constant 0 : index
    %c0_36 = arith.constant 0 : index
    %c0_37 = arith.constant 0 : index
    %101 = vector.load %arg4[%c0_35, %c0_36, %c0_37] : memref<1x1x16xf32, #tpu.memory_space<vmem>>, vector<1x1x16xf32>
    %102 = vector.shape_cast %101 : vector<1x1x16xf32> to vector<1x16xf32>
    %103 = vector.shape_cast %100 : vector<1x16xf32> to vector<1x1x16xf32>
    tpu.vector_store %arg4[%c0_35, %c0_36, %c0_37], %103 {strides = array<i32>} : memref<1x1x16xf32, #tpu.memory_space<vmem>>, vector<1x1x16xf32>,
    return
  }
  func.func @transform_0(%arg0: i32) -> (i32, i32, i32) {
    %c0_i32 = arith.constant 0 : i32
    %c0_i32_0 = arith.constant 0 : i32
    %c0_i32_1 = arith.constant 0 : i32
    return %arg0, %c0_i32, %c0_i32_0 : i32, i32, i32
  }
  func.func @transform_1(%arg0: i32) -> (i32, i32, i32) {
    %c0_i32 = arith.constant 0 : i32
    %c0_i32_0 = arith.constant 0 : i32
    %c0_i32_1 = arith.constant 0 : i32
    return %arg0, %c0_i32, %c0_i32_0 : i32, i32, i32
  }
  func.func @transform_2(%arg0: i32) -> (i32, i32, i32) {
    %c0_i32 = arith.constant 0 : i32
    %c0_i32_0 = arith.constant 0 : i32
    %c0_i32_1 = arith.constant 0 : i32
    return %arg0, %c0_i32, %c0_i32_0 : i32, i32, i32
  }
  func.func @transform_3(%arg0: i32) -> (i32, i32, i32) {
    %c0_i32 = arith.constant 0 : i32
    %c0_i32_0 = arith.constant 0 : i32
    %c0_i32_1 = arith.constant 0 : i32
    return %arg0, %c0_i32, %c0_i32_0 : i32, i32, i32
  }
}

</mosaic_0001>

<bundles_post_ra>
// kernel: tpu_custom_call.1
= control target key start
LH: loop header
LB: loop body
LE: loop exit
PB: predicated region body
PF: predicated region fallthrough
CT: control target
= control target key end

     0   :  { %8 = vsyncpa [#allocation3], 0  ;;  %s1124_s0 = inlined_call_operand.hbm [shape: f32[2,16,32], index: 0, kind: input, shape index: {}]   ;;  %s1125_s1 = inlined_call_operand.hbm [shape: f32[2,1,16], index: 1, kind: input, shape index: {}]   ;;  %s1126_s2 = inlined_call_operand.vmem [shape: f32[2,1,16], index: 2, kind: input, shape index: {}]   ;;  %s1127_s3 = inlined_call_operand.hbm [shape: f32[2,1,16], index: 3, kind: output, shape index: {}]  }
   0x1   :  { %10 = vsyncpa [#allocation3 + $0x1], 0 }
   0x2   :  { %11 = vsyncpa [#allocation6], 0 }
   0x3   :  { %13 = vsyncpa [#allocation6 + $0x1], 0 }
   0x4   :  { %14 = vsyncpa [#allocation4], 0 }
   0x5   :  { %16 = vsyncpa [#allocation4 + $0x1], 0  ;;  %s865_s12 = smov 0   ;;  %s867_s13 = smov 0  }
   0x6   :  { %s869_s14 = smov 0   ;;  %s871_s15 = smov 0  }
   0x7 LB: > { %s886_s16 = sadd.s32 4294967295, %s837_s15   ;;  %s624_s17 = sadd.s32 4294967294, %s837_s15   ;;  %s837_s15 = sphi %s871_s15, %s1144_s15   ;;  %s833_s14 = sphi %s869_s14, %s1143_s14   ;;  %s829_s13 = sphi %s867_s13, %s1142_s13   ;;  %s825_s12 = sphi %s865_s12, %s1141_s12  }
   0x8   : > { %s890_s18 = sadd.s32 1, %s837_s15   ;;  %s29_s19 = sadd.s32 1, %s833_s14 }
   0x9   : > { %s26_s20 = ssub.s32 %s837_s15, %s890_s18  ;;  %p36_p0 = scmp.ne.s32.totalorder %s833_s14, %s829_s13 }
   0xa   : > { %p27_p1 = scmp.eq.s32.totalorder %s26_s20, 0  ;;  %p37_p2 = scmp.eq.s32.totalorder %s837_s15, 0 }
   0xb   : > { %p42_p3 = scmp.ne.s32.totalorder %s829_s13, %s825_s12  ;;  %p43_p4 = scmp.eq.s32.totalorder %s886_s16, 0 }
   0xc   : > { %s902_s21 = scalar_select %p27_p1, %s833_s14, %s29_s19  }
   0xd   : > { %p904_p5 = por %p37_p2, %p36_p0  ;;  %p908_p6 = por %p43_p4, %p42_p3 }
   0xe   : > { %p118_p7 = scmp.eq.s32.totalorder %s886_s16, 1  ;;  %p124_p8 = scmp.eq.s32.totalorder %s624_s17, 1 }
   0xf   : > { %s1131_s23 = scalar_select %p908_p6, 1, 0 }
  0x10   : > { %p672_p10 = scmp.lt.s32.totalorder %s837_s15, 2  ;;  %p915_p11 = por %p118_p7, %p36_p0 }
  0x11   : > { %p919_p12 = por %p124_p8, %p42_p3  ;;  %s924_s26 = sand.u32 1, %s833_s14  }
  0x12   : > { %s1132_s24 = scalar_select %p915_p11, 1, 0 }
  0x13   : > { %s1133_s25 = scalar_select %p919_p12, 1, 0 }
  0x14   : > { %s643_s27 = sshll.u32 %s837_s15, 8  ;;  %s627_s28 = sshll.u32 %s924_s26, 4 }
  0x15   : > { %s931_s4 = scalar_lea.hbm %s1124_s0, %s643_s27  ;;  %s148_s5 = scalar_lea.vmem [#allocation2], %s627_s28 }
  0x16   : > { %s155_s6 = sshll.u32 %s148_s5, 4  ;;  %p935_p13 = pnand %p672_p10, %p904_p5  ;;  %s939_s6 = int_to_ptr.vmem [resolvable:$true] %s155_s6 }
  0x17   : > { %s145_s8 = scalar_lea.sflag [#allocation3], %s924_s26  ;;  %s713_s9 = scalar_lea.hbm %s931_s4, 256 }
  0x18   : > { %p714_p0 = scmp.ne.s32.totalorder %s931_s4, %s713_s9  ;;  %p715_p1 = pneg %p935_p13 }
  0x19   : > { %s718_s17 = scalar_lea.hbm %s1124_s0, 512  ;;  %p719_p4 = scmp.lt.s32.totalorder %s931_s4, %s1124_s0 }
  0x1a   : > { %p716_p2 = pnand %p715_p1, %p714_p0  ;;  %p720_p5 = scmp.lt.s32.totalorder %s718_s17, %s713_s9 }
  0x1c   : > { %p717_p3 = pneg %p716_p2  ;;  %p721_p7 = por %p720_p5, %p719_p4 }
  0x1e   : > { %p722_p8 = pnand %p721_p7, %p717_p3 }
  0x20   : > { %725 = shalt.err (!%p722_p8)
}
  0x21   : > { %s726_s22 = scalar_lea.vmem %s939_s6, 256  ;;  %s839_s27 = smov [#allocation2]  }
  0x22   : > { %p727_p10 = scmp.ne.s32.totalorder %s939_s6, %s726_s22  ;;  %s731_s28 = sshll.u32 %s839_s27, 4  ;;  %s732_s28 = int_to_ptr.vmem [resolvable:$false] %s731_s28 }
  0x23   : > { %s733_s29 = scalar_lea.vmem %s732_s28, 512  ;;  %p734_p9 = scmp.lt.s32.totalorder %s939_s6, %s732_s28 }
  0x24   : > { %p729_p0 = pnand %p727_p10, %p715_p1  ;;  %p735_p12 = scmp.lt.s32.totalorder %s733_s29, %s726_s22 }
  0x26   : > { %p730_p2 = pneg %p729_p0  ;;  %p736_p11 = por %p735_p12, %p734_p9 }
  0x28   : > { %p737_p4 = pnand %p736_p11, %p730_p2 }
  0x2a   : > { %740 = shalt.err (!%p737_p4)
}
  0x2b   : > { %s840_s30 = smov 128   ;;  %s841_s5 = smov 8  }
  0x2c   : > { %664 = dma.hbm_to_vmem [thread:$0]  (!%p935_p13), %s931_s4, 256, %s939_s6, %s145_s8, %s840_s30, %s840_s30, %s841_s5  }
  0x2d   : > { %p631_p3 = scmp.ge.s32.totalorder %s837_s15, 1  ;;  %p186_p5 = scmp.lt.s32.totalorder %s837_s15, 3 }
  0x2e   : > { %s630_s10 = sshll.u32 %s837_s15, 4  ;;  %s168_s20 = scalar_lea.vmem [#allocation5], %s924_s26 }
  0x2f   : > { %p970_p9 = pnand %p631_p3, %p186_p5  ;;  %s978_s19 = scalar_lea.hbm %s1125_s1, %s630_s10 }
  0x30   : > { %s175_s22 = sshll.u32 %s168_s20, 4  ;;  %s166_s27 = scalar_lea.sflag [#allocation6], %s924_s26  ;;  %s176_s22 = int_to_ptr.vmem [resolvable:$true] %s175_s22 }
  0x31   : > { %s1135_s9 = scalar_select %p970_p9, 1, 0 }
  0x32   : > { %s741_s4 = scalar_lea.hbm %s978_s19, 16  ;;  %s746_s28 = scalar_lea.hbm %s1125_s1, 32 }
  0x33   : > { %p742_p11 = scmp.ne.s32.totalorder %s978_s19, %s741_s4  ;;  %p747_p8 = scmp.lt.s32.totalorder %s978_s19, %s1125_s1 }
  0x34   : > { %p748_p10 = scmp.lt.s32.totalorder %s746_s28, %s741_s4 }
  0x35   : > { %p744_p12 = pnand %p742_p11, %p715_p1 }
  0x36   : > { %p749_p0 = por %p748_p10, %p747_p8 }
  0x37   : > { %p745_p7 = pneg %p744_p12 }
  0x39   : > { %p750_p2 = pnand %p749_p0, %p745_p7 }
  0x3b   : > { %753 = shalt.err (!%p750_p2)
}
  0x3c   : > { %s754_s5 = scalar_lea.vmem %s176_s22, 16  ;;  %s842_s26 = smov [#allocation5]  }
  0x3d   : > { %p755_p4 = scmp.ne.s32.totalorder %s176_s22, %s754_s5  ;;  %s759_s10 = sshll.u32 %s842_s26, 4  ;;  %s760_s10 = int_to_ptr.vmem [resolvable:$false] %s759_s10 }
  0x3e   : > { %s761_s11 = scalar_lea.vmem %s760_s10, 32  ;;  %p762_p11 = scmp.lt.s32.totalorder %s176_s22, %s760_s10 }
  0x3f   : > { %p757_p3 = pnand %p755_p4, %p715_p1  ;;  %p763_p12 = scmp.lt.s32.totalorder %s761_s11, %s754_s5 }
  0x41   : > { %p758_p5 = pneg %p757_p3  ;;  %p764_p6 = por %p763_p12, %p762_p11 }
  0x43   : > { %p765_p9 = pnand %p764_p6, %p758_p5 }
  0x45   : > { %768 = shalt.err (!%p765_p9)
}
  0x46   : > { %667 = dma.hbm_to_vmem [thread:$0]  (!%p935_p13), %s978_s19, 16, %s176_s22, %s166_s27  }
  0x47   : > { %p1136_p7 = scmp.ne.s32.totalorder %s1135_s9, 0 }
  0x48   : > { %s1003_s17 = sand.u32 (!%p1136_p7), 1, %s829_s13   ;;  %p1137_p1 = scmp.ne.s32.totalorder (!%p1136_p7), %s1131_s23, 0 }
  0x49   : > { %190 = sbr.rel (%p1136_p7) target bundleno = 628 (0x274), region = 32  ;;  %s632_s20 = sshll.u32 (!%p1136_p7), %s1003_s17, 4 }
  0x4a   : > { %s193_s4 = scalar_lea.sflag (!%p1136_p7), [#allocation3], %s1003_s17  ;;  %s196_s6 = scalar_lea.vmem (!%p1136_p7), [#allocation2], %s632_s20 }
  0x4e   : > { %812 = dma.done.wait (%p1137_p1), %s193_s4, 256  }
  0x4f   : > { %814 = vsyncadd (%p1137_p1), %s193_s4, 4294967040  ;;  %s202_s7 = scalar_lea.sflag [#allocation6], %s1003_s17  ;;  %s204_s9 = scalar_lea.vmem [#allocation5], %s1003_s17 }
  0x50   : > { %816 = dma.done.wait (%p1137_p1), %s202_s7, 16  }
  0x51   : > { %818 = vsyncadd (%p1137_p1), %s202_s7, 4294967280  ;;  %vm242_vm0 = vcmask 261120   ;;  %v237_v0 = vld [vmem:[%s196_s6 + $0x8] sm:$0xff]  ;;  %v236_v1 = vld [vmem:[%s196_s6] sm:$0xff]  ;;  %v346_v7 = vlaneseq  ;;  %vm355_vm3 = vcmask 130048   ;;  %p233_p6 = scmp.lt.s32.totalorder %s886_s16, 1 }
  0x52   : > { %648 = vmatprep.subr.msk.mxu0 %vm242_vm0, %v237_v0  ;;  %652 = vmatprep.mubr.msk.f32.mxu0 %vm242_vm0, %v236_v1  ;;  %v240_v2 = vmul.f32 %v236_v1, %v236_v1  ;;  %v241_v3 = vmul.f32 %v237_v0, %v237_v0  ;;  %v637_v9 = vld [vmem:[%s204_s9] ss:$0 sm:$0xff]  ;;  %s640_s8 = sshll.u32 %s886_s16, 4  ;;  %s232_s28 = scalar_lea.vmem [#allocation7], %s1003_s17 }
  0x53   : > { %649 = vmatpush3.xpose.msk.msra.mxu0 %vm242_vm0, %v237_v0  ;;  %v1017_v10 = vshrl.u32 %v346_v7, 7  ;;  %v1022_v16 = vand.u32 127, %v346_v7  ;;  %s234_s23 = scalar_select %p233_p6, %s886_s16, 1 }
  0x54   : > { %650 = vmatprep.subr.msk.mxu0 %vm242_vm0, %v236_v1  ;;  %v243_v4 = vsel %vm242_vm0, %v240_v2, 0.0  ;;  %v246_v5 = vsel %vm242_vm0, %v241_v3, 0.0  ;;  %s529_s29 = sshll.u32 %s232_s28, 4  ;;  %s527_s26 = scalar_lea.hbm %s1127_s3, %s640_s8  ;;  %s530_s29 = int_to_ptr.vmem [resolvable:$true] %s529_s29 }
  0x55   : > { %244 = vadd.xlane.f32.xlu0 %v243_v4  ;;  %v1020_v15 = vadd.s32 8, %v1017_v10  ;;  %vm351_vm2 = vcmp.eq.s32.totalorder %v1017_v10, %v1022_v16  ;;  %s235_s27 = scalar_lea.vmem %s1126_s2, %s234_s23  ;;  %s517_s10 = scalar_lea.sflag [#allocation4], %s1003_s17 }
  0x56   : > { %s769_s11 = scalar_lea.vmem %s530_s29, 16  ;;  %p1138_p9 = scmp.ne.s32.totalorder %s1132_s24, 0 }
  0x57   : > { %651 = vmatpush3.xpose.msk.msra.mxu0 %vm242_vm0, %v236_v1  ;;  %vm352_vm1 = vcmp.eq.s32.totalorder %v1020_v15, %v1022_v16  ;;  %p770_p13 = scmp.ne.s32.totalorder %s530_s29, %s769_s11  ;;  %s844_s16 = smov [#allocation7]  }
  0x58   : > { %s773_s20 = sshll.u32 %s844_s16, 4  ;;  %s774_s20 = int_to_ptr.vmem [resolvable:$false] %s773_s20 }
  0x59   : > { %247 = vadd.xlane.f32.xlu0 %v246_v5  ;;  %p771_p8 = pnand %p770_p13, %p1138_p9  ;;  %s775_s4 = scalar_lea.vmem %s774_s20, 32 }
  0x5a   : > { %653 = vmatmul.mubr.msk.f32.vlgmr.msra.gmra.mxu0 %vm242_vm0, %v237_v0  ;;  %p776_p0 = scmp.lt.s32.totalorder %s530_s29, %s774_s20  ;;  %p777_p2 = scmp.lt.s32.totalorder %s775_s4, %s769_s11 }
  0x5b   : > { %p772_p10 = pneg %p771_p8 }
  0x5c   : > { %p778_p4 = por %p777_p2, %p776_p0 }
  0x5e   : > { %p779_p3 = pnand %p778_p4, %p772_p10 }
  0xde   : > { %v245_v6 = vpop.xlane.xlu0 %244 }
  0xdf   : > { %v336_v17 = vadd.f32 %v637_v9, %v245_v6 }
  0xe2   : > { %v248_v8 = vpop.xlane.xlu0 %247 }
  0xe3   : > { %v337_v11 = vadd.f32 %v637_v9, %v248_v8 }
 0x11a   : > { %v654_v12 = vpop.f32.mrf.mxu0 }
 0x11b   : > { %v339_v13 = vmul.f32 2.0, %v654_v12 }
 0x11c   : > { %v321_v14 = vpop.f32.mrf.mxu0 }
 0x11d   : > { %v341_v18 = vsub.f32 %v337_v11, %v339_v13  ;;  %v338_v19 = vmul.f32 2.0, %v321_v14 }
 0x11f   : > { %v343_v20 = vmax.f32 %v341_v18, 0.0  ;;  %v340_v21 = vsub.f32 %v336_v17, %v338_v19 }
 0x121   : > { %v1026_v22 = vmul.f32 0.03125, %v343_v20  ;;  %v342_v23 = vmax.f32 %v340_v21, 0.0 }
 0x123   : > { %v1030_v24 = vmul.f32 0.03125, %v342_v23  ;;  %v354_v25 = vsel %vm352_vm1, inf, %v1026_v22  ;;  %v483_v31 = vsel %vm355_vm3, %v1026_v22, -inf }
 0x124   : > { %v357_v29 = vsel %vm355_vm3, %v354_v25, inf }
 0x125   : > { %v480_v26 = vsel %vm355_vm3, %v1030_v24, -inf  ;;  %v353_v27 = vsel %vm351_vm2, inf, %v1030_v24 }
 0x126   : > { %481 = vmax.xlane.f32.xlu1 %v480_v26  ;;  %v356_v28 = vsel %vm355_vm3, %v353_v27, inf }
 0x127   : > { %v358_v30 = vmin.f32 %v356_v28, %v357_v29 }
 0x129   : > { %v359_v32 = vrot.slane %v358_v30, 4 }
 0x12a   : > { %484 = vmax.xlane.f32.xlu1 %v483_v31 }
 0x12b   : > { %v360_v33 = vmin.f32 %v358_v30, %v359_v32 }
 0x12d   : > { %v361_v34 = vrot.slane %v360_v33, 2 }
 0x12f   : > { %v362_v35 = vmin.f32 %v360_v33, %v361_v34 }
 0x131   : > { %v363_v36 = vrot.slane %v362_v35, 1 }
 0x133   : > { %v364_v37 = vmin.f32 %v362_v35, %v363_v36 }
 0x135   : > { %vm365_vm4 = vcmp.eq.f32.partialorder %v353_v27, %v364_v37  ;;  %vm366_vm5 = vcmp.eq.f32.partialorder %v354_v25, %v364_v37 }
 0x136   : > { %v367_v38 = vsel %vm365_vm4, %v1017_v10, 16  ;;  %v368_v39 = vsel %vm366_vm5, %v1020_v15, 16 }
 0x137   : > { %v369_v40 = vsel %vm355_vm3, %v367_v38, 2147483647  ;;  %v370_v41 = vsel %vm355_vm3, %v368_v39, 2147483647 }
 0x138   : > { %vm371_vm6 = vcmp.lt.s32.totalorder %v369_v40, %v370_v41 }
 0x139   : > { %v372_v42 = vsel %vm371_vm6, %v369_v40, %v370_v41 }
 0x13a   : > { %v373_v43 = vrot.slane %v372_v42, 4 }
 0x13c   : > { %vm374_vm7 = vcmp.lt.s32.totalorder %v372_v42, %v373_v43 }
 0x13d   : > { %v375_v44 = vsel %vm374_vm7, %v372_v42, %v373_v43 }
 0x13e   : > { %v376_v45 = vrot.slane %v375_v44, 2 }
 0x140   : > { %vm377_vm8 = vcmp.lt.s32.totalorder %v375_v44, %v376_v45 }
 0x141   : > { %v378_v46 = vsel %vm377_vm8, %v375_v44, %v376_v45 }
 0x142   : > { %v379_v47 = vrot.slane %v378_v46, 1 }
 0x144   : > { %vm380_vm9 = vcmp.lt.s32.totalorder %v378_v46, %v379_v47 }
 0x145   : > { %v381_v48 = vsel %vm380_vm9, %v378_v46, %v379_v47 }
 0x146   : > { %vm382_vm10 = vcmp.eq.s32.totalorder %v1017_v10, %v381_v48  ;;  %vm383_vm11 = vcmp.eq.s32.totalorder %v1020_v15, %v381_v48 }
 0x147   : > { %v384_v49 = vsel %vm382_vm10, inf, %v353_v27  ;;  %v385_v50 = vsel %vm383_vm11, inf, %v354_v25 }
 0x148   : > { %v387_v51 = vsel %vm355_vm3, %v384_v49, inf  ;;  %v388_v52 = vsel %vm355_vm3, %v385_v50, inf }
 0x149   : > { %v389_v53 = vmin.f32 %v387_v51, %v388_v52  ;;  %v239_v51 = vld [vmem:[%s235_s27] sm:$0x1]  ;;  %v470_v52 = vsub.s32 0, %v1017_v10 }
 0x14b   : > { %v390_v54 = vrot.slane %v389_v53, 4 }
 0x14d   : > { %v391_v55 = vmin.f32 %v389_v53, %v390_v54 }
 0x14f   : > { %v392_v56 = vrot.slane %v391_v55, 2 }
 0x151   : > { %v393_v57 = vmin.f32 %v391_v55, %v392_v56  ;;  %v843_v55 = vmov 0.0  }
 0x152   : > { %v639_v56 = vsel %vm352_vm1, 1.0, %v843_v55 }
 0x153   : > { %v394_v58 = vrot.slane %v393_v57, 1 }
 0x155   : > { %v395_v59 = vmin.f32 %v393_v57, %v394_v58  ;;  %v638_v57 = vsel %vm351_vm2, 1.0, %v843_v55 }
 0x157   : > { %vm396_vm12 = vcmp.eq.f32.partialorder %v384_v49, %v395_v59  ;;  %vm397_vm13 = vcmp.eq.f32.partialorder %v385_v50, %v395_v59  ;;  %v417_v60 = vadd.f32 %v395_v59, %v364_v37 }
 0x158   : > { %v398_v61 = vsel %vm396_vm12, %v1017_v10, 16  ;;  %v399_v62 = vsel %vm397_vm13, %v1020_v15, 16 }
 0x159   : > { %v400_v63 = vsel %vm355_vm3, %v398_v61, 2147483647  ;;  %v401_v0 = vsel %vm355_vm3, %v399_v62, 2147483647 }
 0x15a   : > { %vm402_vm14 = vcmp.lt.s32.totalorder %v400_v63, %v401_v0 }
 0x15b   : > { %v403_v1 = vsel %vm402_vm14, %v400_v63, %v401_v0 }
 0x15c   : > { %v404_v2 = vrot.slane %v403_v1, 4 }
 0x15e   : > { %vm405_vm15 = vcmp.lt.s32.totalorder %v403_v1, %v404_v2 }
 0x15f   : > { %v406_v3 = vsel %vm405_vm15, %v403_v1, %v404_v2 }
 0x160   : > { %v407_v4 = vrot.slane %v406_v3, 2 }
 0x162   : > { %vm408_vm0 = vcmp.lt.s32.totalorder %v406_v3, %v407_v4 }
 0x163   : > { %v409_v5 = vsel %vm408_vm0, %v406_v3, %v407_v4 }
 0x164   : > { %v410_v6 = vrot.slane %v409_v5, 1 }
 0x166   : > { %vm411_vm4 = vcmp.lt.s32.totalorder %v409_v5, %v410_v6 }
 0x167   : > { %v412_v7 = vsel %vm411_vm4, %v409_v5, %v410_v6 }
 0x168   : > { %vm413_vm5 = vcmp.eq.s32.totalorder %v1017_v10, %v412_v7  ;;  %vm414_vm6 = vcmp.eq.s32.totalorder %v1020_v15, %v412_v7 }
 0x169   : > { %v415_v8 = vsel %vm413_vm5, inf, %v384_v49  ;;  %v416_v9 = vsel %vm414_vm6, inf, %v385_v50 }
 0x16a   : > { %v418_v11 = vsel %vm355_vm3, %v415_v8, inf  ;;  %v419_v12 = vsel %vm355_vm3, %v416_v9, inf }
 0x16b   : > { %v420_v13 = vmin.f32 %v418_v11, %v419_v12 }
 0x16d   : > { %v421_v14 = vrot.slane %v420_v13, 4 }
 0x16f   : > { %v422_v17 = vmin.f32 %v420_v13, %v421_v14 }
 0x171   : > { %v423_v18 = vrot.slane %v422_v17, 2 }
 0x173   : > { %v424_v19 = vmin.f32 %v422_v17, %v423_v18 }
 0x175   : > { %v425_v20 = vrot.slane %v424_v19, 1 }
 0x177   : > { %v426_v21 = vmin.f32 %v424_v19, %v425_v20 }
 0x179   : > { %vm427_vm7 = vcmp.eq.f32.partialorder %v415_v8, %v426_v21  ;;  %vm428_vm8 = vcmp.eq.f32.partialorder %v416_v9, %v426_v21  ;;  %v448_v45 = vadd.f32 %v426_v21, %v417_v60 }
 0x17a   : > { %v429_v23 = vsel %vm427_vm7, %v1017_v10, 16  ;;  %v430_v25 = vsel %vm428_vm8, %v1020_v15, 16 }
 0x17b   : > { %v431_v26 = vsel %vm355_vm3, %v429_v23, 2147483647  ;;  %v432_v27 = vsel %vm355_vm3, %v430_v25, 2147483647 }
 0x17c   : > { %vm433_vm9 = vcmp.lt.s32.totalorder %v431_v26, %v432_v27 }
 0x17d   : > { %v434_v28 = vsel %vm433_vm9, %v431_v26, %v432_v27 }
 0x17e   : > { %v435_v29 = vrot.slane %v434_v28, 4 }
 0x180   : > { %vm436_vm10 = vcmp.lt.s32.totalorder %v434_v28, %v435_v29 }
 0x181   : > { %v437_v30 = vsel %vm436_vm10, %v434_v28, %v435_v29 }
 0x182   : > { %v438_v31 = vrot.slane %v437_v30, 2 }
 0x184   : > { %vm439_vm11 = vcmp.lt.s32.totalorder %v437_v30, %v438_v31 }
 0x185   : > { %v440_v32 = vsel %vm439_vm11, %v437_v30, %v438_v31 }
 0x186   : > { %v441_v33 = vrot.slane %v440_v32, 1 }
 0x188   : > { %vm442_vm12 = vcmp.lt.s32.totalorder %v440_v32, %v441_v33 }
 0x189   : > { %v443_v34 = vsel %vm442_vm12, %v440_v32, %v441_v33 }
 0x18a   : > { %vm444_vm13 = vcmp.eq.s32.totalorder %v1017_v10, %v443_v34  ;;  %vm445_vm14 = vcmp.eq.s32.totalorder %v1020_v15, %v443_v34 }
 0x18b   : > { %v446_v35 = vsel %vm444_vm13, inf, %v415_v8  ;;  %v447_v36 = vsel %vm445_vm14, inf, %v416_v9 }
 0x18c   : > { %v449_v37 = vsel %vm355_vm3, %v446_v35, inf  ;;  %v450_v38 = vsel %vm355_vm3, %v447_v36, inf }
 0x18d   : > { %v451_v39 = vmin.f32 %v449_v37, %v450_v38 }
 0x18f   : > { %v452_v40 = vrot.slane %v451_v39, 4 }
 0x191   : > { %v453_v41 = vmin.f32 %v451_v39, %v452_v40 }
 0x193   : > { %v454_v42 = vrot.slane %v453_v41, 2 }
 0x195   : > { %v455_v43 = vmin.f32 %v453_v41, %v454_v42 }
 0x197   : > { %v456_v44 = vrot.slane %v455_v43, 1 }
 0x199   : > { %v457_v46 = vmin.f32 %v455_v43, %v456_v44 }
 0x19b   : > { %v458_v47 = vadd.f32 %v457_v46, %v448_v45 }
 0x19d   : > { %v459_v48 = vmul.f32 0.2, %v458_v47 }
 0x19f   : > { %v460_v49 = vsub.f32 0.0, %v459_v48 }
 0x1a1   : > { %v461_v50 = vmul.f32 1.442695, %v460_v49 }
 0x1a3   : > { %709 = vpow2.f32 %v461_v50 }
 0x1af   : > { %v482_v63 = vpop.xlane.xlu1 %481 }
 0x1b0   : > { %v710_v53 = vpop.eup %709 }
 0x1b1   : > { %v463_v54 = vadd.f32 %v710_v53, %v239_v51 }
 0x1b3   : > { %v471_v58 = vrot.slane %v463_v54, %v470_v52  ;;  %v485_v0 = vpop.xlane.xlu1 %484 }
 0x1b4   : > { %v486_v1 = vmax.f32 %v482_v63, %v485_v0 }
 0x1b5   : > { %v473_v59 = vmul.f32 %v639_v56, %v471_v58  ;;  %v472_v60 = vmul.f32 %v638_v57, %v471_v58 }
 0x1b6   : > { %v487_v2 = vrot.slane %v486_v1, 4 }
 0x1b7   : > { %v477_v61 = vsel %vm355_vm3, %v473_v59, 0.0  ;;  %v474_v62 = vsel %vm355_vm3, %v472_v60, 0.0 }
 0x1b8   : > { %478 = vadd.xlane.f32.xlu1 %v477_v61  ;;  %475 = vadd.xlane.f32.xlu0 %v474_v62  ;;  %v488_v3 = vmax.f32 %v486_v1, %v487_v2 }
 0x1ba   : > { %v489_v15 = vrot.slane %v488_v3, 2 }
 0x1bc   : > { %v490_v4 = vmax.f32 %v488_v3, %v489_v15 }
 0x1be   : > { %v491_v5 = vrot.slane %v490_v4, 1 }
 0x1c0   : > { %v492_v6 = vmax.f32 %v490_v4, %v491_v5 }
 0x241   : > { %v479_v10 = vpop.xlane.xlu1 %478  ;;  %v476_v16 = vpop.xlane.xlu0 %475 }
 0x242   : > { %vm494_vm1 = vcmp.gt.f32.partialorder %v479_v10, %v471_v58  ;;  %vm493_vm2 = vcmp.gt.f32.partialorder %v476_v16, %v471_v58 }
 0x243   : > { %v496_v7 = vsel %vm494_vm1, %v1026_v22, %v492_v6  ;;  %v495_v8 = vsel %vm493_vm2, %v1030_v24, %v492_v6 }
 0x244   : > { %v498_v9 = vsel %vm355_vm3, %v496_v7, inf  ;;  %v497_v11 = vsel %vm355_vm3, %v495_v8, inf  ;;  %vm514_vm3 = vcmask 122880  }
 0x245   : > { %v499_v12 = vmin.f32 %v497_v11, %v498_v9 }
 0x247   : > { %v500_v13 = vrot.slane %v499_v12, 4 }
 0x249   : > { %v501_v14 = vmin.f32 %v499_v12, %v500_v13 }
 0x24b   : > { %v502_v17 = vrot.slane %v501_v14, 2 }
 0x24d   : > { %v503_v18 = vmin.f32 %v501_v14, %v502_v17 }
 0x24f   : > { %v504_v19 = vrot.slane %v503_v18, 1 }
 0x251   : > { %v505_v20 = vmin.f32 %v503_v18, %v504_v19 }
 0x253   : > { %711 = vrsqrt.f32 %v505_v20  ;;  %vm508_vm15 = vcmp.eq.f32.partialorder %v505_v20, inf  ;;  %v511_v22 = vand.u32 2147483648, %v505_v20  ;;  %vm510_vm0 = vcmp.eq.f32.partialorder %v505_v20, 0.0 }
 0x260   : > { %v712_v21 = vpop.eup %711 }
 0x261   : > { %v507_v23 = vmul.f32 %v712_v21, %v505_v20 }
 0x263   : > { %v509_v24 = vsel %vm508_vm15, %v505_v20, %v507_v23 }
 0x264   : > { %v512_v25 = vsel %vm510_vm0, %v511_v22, %v509_v24 }
 0x265   : > { %v513_v26 = vmul.f32 %v512_v25, %v463_v54 }
 0x267   : > { %515 = vst.msk [vmem:[%s232_s28] sm:$0x1] %vm514_vm3, %v513_v26 }
 0x268   : > { %782 = shalt.err (!%p779_p3)
}
 0x269   : > { %s783_s6 = scalar_lea.hbm %s527_s26, 16  ;;  %s787_s9 = scalar_lea.hbm %s1127_s3, 32 }
 0x26a   : > { %p784_p5 = scmp.ne.s32.totalorder %s527_s26, %s783_s6  ;;  %p788_p7 = scmp.lt.s32.totalorder %s527_s26, %s1127_s3 }
 0x26b   : > { %p789_p1 = scmp.lt.s32.totalorder %s787_s9, %s783_s6 }
 0x26c   : > { %p785_p11 = pnand %p784_p5, %p1138_p9 }
 0x26d   : > { %p790_p6 = por %p789_p1, %p788_p7 }
 0x26e   : > { %p786_p12 = pneg %p785_p11 }
 0x270   : > { %p791_p13 = pnand %p790_p6, %p786_p12 }
 0x272   : > { %794 = shalt.err (!%p791_p13)
}
 0x273   : > { %659 = dma.vmem_to_hbm [thread:$0]  (%p1138_p9), %s530_s29, 16, %s527_s26, %s517_s10  }
 0x274 PF: > { %s541_s22 = sand.u32 1, %s825_s12   ;;  %p1139_p8 = scmp.ne.s32.totalorder %s1133_s25, 0 }
 0x275   : > { %p1140_p10 = scmp.ge.s32.totalorder %s837_s15, 2  ;;  %s542_s27 = scalar_lea.sflag [#allocation4], %s541_s22 }
 0x277   : > { %p669_p0 = pnand %p1140_p10, %p1139_p8 }
 0x279   : > { %p670_p2 = pneg %p669_p0 }
 0x27b   : > { %820 = dma.done.wait (%p670_p2), %s542_s27, 16  }
 0x27c   : > { %822 = vsyncadd (%p670_p2), %s542_s27, 4294967280  ;;  %p19_p4 = scmp.ge.s32.totalorder %s890_s18, 4   ;;  %s1141_s12 = smov %s829_s13 }
 0x27d   : > { %s1142_s13 = smov %s833_s14  ;;  %s1143_s14 = smov %s902_s21 }
 0x27e   : > { %s1144_s15 = smov %s890_s18  ;;  %21 = sbr.rel (!%p19_p4) target bundleno = 7 (0x7), region = 93 }
 0x283   :  { %546 = vsyncpa [#allocation3], 1 }
 0x284   :  { %548 = vsyncpa [#allocation3 + $0x1], 1 }
 0x285   :  { %549 = vsyncpa [#allocation6], 1 }
 0x286   :  { %551 = vsyncpa [#allocation6 + $0x1], 1 }
 0x287   :  { %552 = vsyncpa [#allocation4], 1 }
 0x288   :  { %554 = vsyncpa [#allocation4 + $0x1], 1 }

</bundles_post_ra>
